<compile_context>
chip_gen: v7x
topology: tpu7x:2x2x1
jax: 0.10.0
libtpu: 0.0.40
codegen_flags: <defaults>
</compile_context>

<pallas_src>
import functools

import jax
import jax.numpy as jnp
from jax.experimental import pallas as pl
from jax.experimental.pallas import tpu as pltpu


# ----------------------------------------------------------------------------
# Pallas kernels
# ----------------------------------------------------------------------------
def _nearest_kernel(x_ref, o_ref, *, s, W):
    # x_ref: (rb, W)       rows = flattened (n, c, h); lanes = w
    # o_ref: (rb, s*W*s)   row r holds the s output rows produced by input row
    #                      r, laid out [dh, w_out]; the row-major reshape in
    #                      the wrapper (free) turns this into (H*s, W*s).
    x = x_ref[...]
    # 0/1 lane-replication matrix rep[w, j] = (j // s == w), built from iota so
    # no HBM-side constant is needed.  Replication by 0/1 is exact in any dtype.
    w_idx = jax.lax.broadcasted_iota(jnp.int32, (W, W * s), 0)
    j_idx = jax.lax.broadcasted_iota(jnp.int32, (W, W * s), 1)
    rep = ((j_idx >= w_idx * s) & (j_idx < w_idx * s + s)).astype(x.dtype)
    y = jnp.dot(x, rep, preferred_element_type=jnp.float32).astype(o_ref.dtype)
    # Row (H) replication: tile along lanes (supported concat); it becomes a
    # row-repeat after the free reshape outside the kernel.
    o_ref[...] = jnp.concatenate([y] * s, axis=1) if s > 1 else y


def _transconv_kernel(w_ref, b_ref, x_ref, o_ref):
    # w_ref: (Kco, Cin)   b_ref: (Kco, 1)   x_ref: (1, Cin, pb)   o_ref: (1, Kco, pb)
    acc = jnp.dot(w_ref[...], x_ref[0], preferred_element_type=jnp.float32)
    o_ref[0] = (acc + b_ref[...]).astype(o_ref.dtype)


# ----------------------------------------------------------------------------
# Wrappers (pallas_call + free reshapes)
# ----------------------------------------------------------------------------
def nearest_upsample(x, scale_factor):
    """F.interpolate(x, scale_factor=s, mode='nearest') for NCHW input."""
    s = int(scale_factor)
    N, C, H, W = x.shape
    if s == 1:
        return x

    R = N * C * H
    xf = x.reshape(R, W)  # free (row-major merge)

    ebytes = jnp.dtype(x.dtype).itemsize
    bytes_per_row = (W + s * s * W) * ebytes          # in + out per input row
    rb = min(R, max(8, (4 << 20) // bytes_per_row))   # ~4 MiB per step (x2 bufs)
    if rb < R:
        rb = max(8, (rb // 8) * 8)

    out = pl.pallas_call(
        functools.partial(_nearest_kernel, s=s, W=W),
        out_shape=jax.ShapeDtypeStruct((R, s * W * s), x.dtype),
        grid_spec=pltpu.PrefetchScalarGridSpec(
            num_scalar_prefetch=0,
            grid=(pl.cdiv(R, rb),),
            in_specs=[pl.BlockSpec((rb, W), lambda i: (i, 0))],
            out_specs=pl.BlockSpec((rb, s * W * s), lambda i: (i, 0)),
        ),
        compiler_params=pltpu.CompilerParams(dimension_semantics=("parallel",)),
    )(xf)
    # (R, s*W*s) -> (N, C, H*s, W*s) is a pure row-major reinterpretation (free).
    return out.reshape(N, C, H * s, W * s)


def transconv_upsample(x, weight, bias, stride):
    """ConvTranspose2d with kernel_size == stride (non-overlapping deconv).

    x:      (N, Cin, H, W)
    weight: (Cin, Cout, k, k)   -- PyTorch ConvTranspose2d layout
    bias:   (Cout,)
    out:    (N, Cout, H*k, W*k)
    """
    N, C_in, H, W = x.shape
    C_in_w, C_out, kH, kW = weight.shape
    assert kH == stride and kW == stride and C_in_w == C_in
    s = stride
    P = H * W
    Kco = C_out * s * s

    x3 = x.reshape(N, C_in, P)                                   # free
    w2t = weight.reshape(C_in, Kco).T                            # tiny
    b2 = jnp.repeat(bias.astype(jnp.float32), s * s).reshape(Kco, 1)

    ebytes = jnp.dtype(x.dtype).itemsize
    bytes_per_px = (C_in + Kco) * ebytes
    pb = min(P, max(128, (4 << 20) // bytes_per_px))
    if pb < P:
        pb = max(128, (pb // 128) * 128)

    out3 = pl.pallas_call(
        _transconv_kernel,
        out_shape=jax.ShapeDtypeStruct((N, Kco, P), x.dtype),
        grid_spec=pltpu.PrefetchScalarGridSpec(
            num_scalar_prefetch=0,
            grid=(N, pl.cdiv(P, pb)),
            in_specs=[
                pl.BlockSpec((Kco, C_in), lambda n, j: (0, 0)),
                pl.BlockSpec((Kco, 1), lambda n, j: (0, 0)),
                pl.BlockSpec((1, C_in, pb), lambda n, j: (n, 0, j)),
            ],
            out_specs=pl.BlockSpec((1, Kco, pb), lambda n, j: (n, 0, j)),
        ),
        compiler_params=pltpu.CompilerParams(
            dimension_semantics=("parallel", "parallel")),
    )(w2t, b2, x3)

    # Tap scatter: (N,Cout,s,s,H,W) -> (N,Cout,H,s,W,s) -> NCHW*s.
    # TODO(synk): this interleave is the one remaining XLA transpose pass;
    # fusing it would require lane-strided stores inside the kernel.
    out = out3.reshape(N, C_out, s, s, H, W).transpose(0, 1, 4, 2, 5, 3)
    return out.reshape(N, C_out, H * s, W * s)


# ----------------------------------------------------------------------------
# Module equivalents
# ----------------------------------------------------------------------------
class NearstUpsample:
    def __init__(self, scale_factor=2, **_):
        self.scale_factor = scale_factor

    def __call__(self, cls, reg):
        return (nearest_upsample(cls, self.scale_factor),
                nearest_upsample(reg, self.scale_factor))


class TransConvUpsample:
    # TODO(synk): original TransConvUpsample source not provided; assumed one
    # ConvTranspose2d(k=stride) branch for cls and one for reg, channel-preserving.
    def __init__(self, cls_channels, reg_channels, kernel_size=2, stride=2, seed=0, **_):
        self.k = kernel_size
        self.stride = stride
        key = jax.random.PRNGKey(seed)
        k1, k2, k3, k4 = jax.random.split(key, 4)
        fan_cls = cls_channels * kernel_size * kernel_size
        fan_reg = reg_channels * kernel_size * kernel_size
        self.w_cls = jax.random.normal(k1, (cls_channels, cls_channels, kernel_size, kernel_size),
                                       jnp.float32) / jnp.sqrt(fan_cls)
        self.b_cls = jax.random.normal(k2, (cls_channels,), jnp.float32) * 0.01
        self.w_reg = jax.random.normal(k3, (reg_channels, reg_channels, kernel_size, kernel_size),
                                       jnp.float32) / jnp.sqrt(fan_reg)
        self.b_reg = jax.random.normal(k4, (reg_channels,), jnp.float32) * 0.01

    def __call__(self, cls, reg):
        return (transconv_upsample(cls, self.w_cls, self.b_cls, self.stride),
                transconv_upsample(reg, self.w_reg, self.b_reg, self.stride))


class PostProcess:
    def __init__(self, opt):
        self.opt = opt
        self.postprocess = self.init_postprocess(dict(opt["model"]["postprocess"]))

    def init_postprocess(self, postprocess_opt):
        method = postprocess_opt.pop("upsample_method")
        if method == "NearstUpsample":
            return NearstUpsample(**postprocess_opt)
        elif method == "TransConvUpsample":
            return TransConvUpsample(**postprocess_opt)
        else:
            raise NameError("{} not in the postprocess list!!!".format(method))

    def forward(self, cls, reg):
        return self.postprocess(cls, reg)

    __call__ = forward


# ----------------------------------------------------------------------------
# Main
# ----------------------------------------------------------------------------
if __name__ == "__main__":
    key = jax.random.PRNGKey(0)
    kc, kr = jax.random.split(key)
    N, C_cls, C_reg, H, W = 2, 4, 8, 16, 16
    cls = jax.random.normal(kc, (N, C_cls, H, W), jnp.float32)
    reg = jax.random.normal(kr, (N, C_reg, H, W), jnp.float32)

    # --- NearstUpsample path -------------------------------------------------
    opt_nn = {"model": {"postprocess": {"upsample_method": "NearstUpsample",
                                        "scale_factor": 2}}}
    pp_nn = PostProcess(opt_nn)
    cls_up, reg_up = pp_nn(cls, reg)
    cls_up, reg_up = jax.block_until_ready((cls_up, reg_up))

    ref_cls = jnp.repeat(jnp.repeat(cls, 2, axis=2), 2, axis=3)
    ref_reg = jnp.repeat(jnp.repeat(reg, 2, axis=2), 2, axis=3)
    assert cls_up.shape == (N, C_cls, 2 * H, 2 * W)
    assert reg_up.shape == (N, C_reg, 2 * H, 2 * W)
    assert jnp.allclose(cls_up, ref_cls, atol=1e-5)
    assert jnp.allclose(reg_up, ref_reg, atol=1e-5)

    # --- TransConvUpsample path ---------------------------------------------
    opt_tc = {"model": {"postprocess": {"upsample_method": "TransConvUpsample",
                                        "cls_channels": C_cls,
                                        "reg_channels": C_reg,
                                        "kernel_size": 2,
                                        "stride": 2,
                                        "seed": 0}}}
    pp_tc = PostProcess(opt_tc)
    cls_tc, reg_tc = pp_tc(cls, reg)
    cls_tc, reg_tc = jax.block_until_ready((cls_tc, reg_tc))

    def ref_transconv(x, w, b, s):
        # out[n, co, s*h+kh, s*w+kw] = sum_ci x[n,ci,h,w] * w[ci,co,kh,kw] + b[co]
        o = jnp.einsum("nchw,cokl->nhwokl", x, w)
        Nn, Hh, Ww, Co, Kh, Kw = o.shape
        o = o.transpose(0, 3, 1, 4, 2, 5).reshape(Nn, Co, Hh * Kh, Ww * Kw)
        return o + b[None, :, None, None]

    ref_cls_tc = ref_transconv(cls, pp_tc.postprocess.w_cls, pp_tc.postprocess.b_cls, 2)
    ref_reg_tc = ref_transconv(reg, pp_tc.postprocess.w_reg, pp_tc.postprocess.b_reg, 2)
    assert cls_tc.shape == (N, C_cls, 2 * H, 2 * W)
    assert reg_tc.shape == (N, C_reg, 2 * H, 2 * W)
    assert jnp.allclose(cls_tc, ref_cls_tc, atol=1e-4)
    assert jnp.allclose(reg_tc, ref_reg_tc, atol=1e-4)

    print("KERNEL_OK")
</pallas_src>

<mosaic_0001>
module attributes {stable_mosaic.version = 11 : i64} {
  func.func @_nearest_kernel(%arg0: i32, %arg1: memref<128x16xf32, #tpu.memory_space<vmem>>, %arg2: memref<128x64xf32, #tpu.memory_space<vmem>>) attributes {dimension_semantics = [#tpu.dimension_semantics<parallel>], iteration_bounds = array<i64: 1>, scalar_prefetch = 0 : i64, scratch_operands = 0 : i64, tpu.core_type = #tpu.core_type<tc>, window_params = [{transform_indices = @transform_0, window_bounds = array<i64: 128, 16>}, {transform_indices = @transform_1, window_bounds = array<i64: 128, 64>}]} {
    %c0 = arith.constant 0 : index
    %c0_0 = arith.constant 0 : index
    %0 = vector.load %arg1[%c0, %c0_0] : memref<128x16xf32, #tpu.memory_space<vmem>>, vector<128x16xf32>
    %1 = tpu.iota {dimensions = array<i32: 0>} : vector<16x32xi32>
    %2 = tpu.iota {dimensions = array<i32: 1>} : vector<16x32xi32>
    %c2_i32 = arith.constant 2 : i32
    %3 = vector.broadcast %c2_i32 : i32 to vector<16x32xi32>
    %4 = arith.muli %1, %3 : vector<16x32xi32>
    %5 = arith.cmpi sge, %2, %4 : vector<16x32xi32>
    %c2_i32_1 = arith.constant 2 : i32
    %6 = vector.broadcast %c2_i32_1 : i32 to vector<16x32xi32>
    %7 = arith.muli %1, %6 : vector<16x32xi32>
    %c2_i32_2 = arith.constant 2 : i32
    %8 = vector.broadcast %c2_i32_2 : i32 to vector<16x32xi32>
    %9 = arith.addi %7, %8 : vector<16x32xi32>
    %10 = arith.cmpi slt, %2, %9 : vector<16x32xi32>
    %11 = arith.andi %5, %10 : vector<16x32xi1>
    %12 = arith.extui %11 : vector<16x32xi1> to vector<16x32xi32>
    %13 = arith.sitofp %12 : vector<16x32xi32> to vector<16x32xf32>
    %cst = arith.constant dense<0.000000e+00> : vector<128x32xf32>
    %14 = tpu.matmul %0, %13, %cst {dimension_numbers = #tpu.dot_dimension_numbers<[1], [0], [0], [1], [0, 0, 1, 1], [], []>} : vector<128x16xf32>, vector<16x32xf32>, vector<128x32xf32> -> vector<128x32xf32>
    %15 = tpu.concatenate %14, %14 in 1 : vector<128x32xf32>, vector<128x32xf32> -> vector<128x64xf32>
    %c0_3 = arith.constant 0 : index
    %c0_4 = arith.constant 0 : index
    %16 = vector.load %arg2[%c0_3, %c0_4] : memref<128x64xf32, #tpu.memory_space<vmem>>, vector<128x64xf32>
    tpu.vector_store %arg2[%c0_3, %c0_4], %15 {strides = array<i32>} : memref<128x64xf32, #tpu.memory_space<vmem>>, vector<128x64xf32>,
    return
  }
  func.func @transform_0(%arg0: i32) -> (i32, i32) {
    %c0_i32 = arith.constant 0 : i32
    %c0_i32_0 = arith.constant 0 : i32
    return %arg0, %c0_i32 : i32, i32
  }
  func.func @transform_1(%arg0: i32) -> (i32, i32) {
    %c0_i32 = arith.constant 0 : i32
    %c0_i32_0 = arith.constant 0 : i32
    return %arg0, %c0_i32 : i32, i32
  }
}

</mosaic_0001>

<bundles_post_ra>
// kernel: tpu_custom_call.1
= control target key start
LH: loop header
LB: loop body
LE: loop exit
PB: predicated region body
PF: predicated region fallthrough
CT: control target
= control target key end

     0   :  { %v24_v0 = vlaneseq  ;;  %vm43_vm0 = vcmask 130048   ;;  %v413_v10 = vmov 1.0|1.0   ;;  %s414_s9 = smov 32   ;;  %vm301_vm8 = vcmask 261120   ;;  %s569_s0 = inlined_call_operand.vmem [shape: f32[128,16], index: 0, kind: input, shape index: {}]   ;;  %s570_s1 = inlined_call_operand.vmem [shape: f32[128,64], index: 1, kind: output, shape index: {}]  }
   0x1   :  { %v8_v1 = vld [vmem:[%s569_s0] sm:$0xff]  ;;  %v9_v11 = vld [vmem:[%s569_s0 + $0x8] sm:$0xff]  ;;  %v10_v13 = vld [vmem:[%s569_s0 + $0x10] sm:$0xff]  ;;  %vm318_vm9 = vcmask 523264  }
   0x2   :  { %v16_v2 = vld [vmem:[%s569_s0 + $0x40] sm:$0xff]  ;;  %v25_v3 = vshrl.u32 %v24_v0, 7  ;;  %v28_v4 = vand.u32 127, %v24_v0  ;;  %381 = vmatprep.mubr.msk.f32.mxu0 %vm43_vm0, %v8_v1  ;;  %v17_v12 = vld [vmem:[%s569_s0 + $0x48] sm:$0xff]  ;;  %v18_v14 = vld [vmem:[%s569_s0 + $0x50] sm:$0xff] }
   0x3   :  { %393 = vmatprep.mubr.msk.f32.mxu1 %vm43_vm0, %v16_v2  ;;  %v11_v15 = vld [vmem:[%s569_s0 + $0x18] sm:$0xff]  ;;  %v12_v17 = vld [vmem:[%s569_s0 + $0x20] sm:$0xff]  ;;  %v13_v19 = vld [vmem:[%s569_s0 + $0x28] sm:$0xff] }
   0x4   :  { %v26_v5 = vadd.s32 8, %v25_v3  ;;  %v29_v6 = vmul.u32 2, %v25_v3  ;;  %v19_v16 = vld [vmem:[%s569_s0 + $0x58] sm:$0xff]  ;;  %v20_v18 = vld [vmem:[%s569_s0 + $0x60] sm:$0xff]  ;;  %v21_v20 = vld [vmem:[%s569_s0 + $0x68] sm:$0xff] }
   0x5   :  { %v14_v21 = vld [vmem:[%s569_s0 + $0x30] sm:$0xff]  ;;  %v15_v23 = vld [vmem:[%s569_s0 + $0x38] sm:$0xff] }
   0x6   :  { %v30_v7 = vmul.u32 2, %v26_v5  ;;  %vm31_vm1 = vcmp.ge.s32.totalorder %v28_v4, %v29_v6  ;;  %v33_v8 = vadd.s32 2, %v29_v6  ;;  %v22_v22 = vld [vmem:[%s569_s0 + $0x70] sm:$0xff]  ;;  %v23_v24 = vld [vmem:[%s569_s0 + $0x78] sm:$0xff] }
   0x8   :  { %vm32_vm2 = vcmp.ge.s32.totalorder %v28_v4, %v30_v7  ;;  %v34_v9 = vadd.s32 2, %v30_v7  ;;  %vm35_vm3 = vcmp.lt.s32.totalorder %v28_v4, %v33_v8 }
   0x9   :  { %vm37_vm4 = vmand %vm31_vm1, %vm35_vm3 }
   0xa   :  { %vm36_vm5 = vcmp.lt.s32.totalorder %v28_v4, %v34_v9 }
   0xb   :  { %vm38_vm6 = vmand %vm32_vm2, %vm36_vm5 }
   0xc   :  { %vm405_vm7 = vmpackc.low %vm38_vm6, %vm37_vm4 }
   0xd   :  { %406 = vmatprep.subr.msk.bf16.mxu0 %vm405_vm7, %v413_v10  ;;  %409 = vmatprep.subr.msk.bf16.mxu1 %vm405_vm7, %v413_v10 }
   0xe   :  { %408 = vmatpush3.bf16.msk.msra.mxu0 %vm405_vm7, %v413_v10  ;;  %410 = vmatpush3.bf16.msk.msra.mxu1 %vm405_vm7, %v413_v10 }
  0x11   :  { %382 = vmatmul.mubr.msk.f32.vlgmr.msra.gmra.mrb[0].mxu0 %vm43_vm0, %v9_v11  ;;  %394 = vmatmul.mubr.msk.f32.vlgmr.msra.gmra.mrb[0].mxu1 %vm43_vm0, %v17_v12 }
  0x12   :  { %384 = vmatprep.mubr.msk.f32.mxu0 %vm43_vm0, %v10_v13  ;;  %396 = vmatprep.mubr.msk.f32.mxu1 %vm43_vm0, %v18_v14 }
  0x15   :  { %385 = vmatmul.mubr.msk.f32.gmra.mrb[2].mxu0 %vm43_vm0, %v11_v15  ;;  %397 = vmatmul.mubr.msk.f32.gmra.mrb[2].mxu1 %vm43_vm0, %v19_v16 }
  0x16   :  { %387 = vmatprep.mubr.msk.f32.mxu0 %vm43_vm0, %v12_v17  ;;  %399 = vmatprep.mubr.msk.f32.mxu1 %vm43_vm0, %v20_v18 }
  0x19   :  { %388 = vmatmul.mubr.msk.f32.gmra.mrb[4].mxu0 %vm43_vm0, %v13_v19  ;;  %400 = vmatmul.mubr.msk.f32.gmra.mrb[4].mxu1 %vm43_vm0, %v21_v20 }
  0x1a   :  { %390 = vmatprep.mubr.msk.f32.mxu0 %vm43_vm0, %v14_v21  ;;  %402 = vmatprep.mubr.msk.f32.mxu1 %vm43_vm0, %v22_v22 }
  0x1d   :  { %391 = vmatmul.mubr.msk.f32.gmra.mrb[6].mxu0 %vm43_vm0, %v15_v23  ;;  %403 = vmatmul.mubr.msk.f32.gmra.mrb[6].mxu1 %vm43_vm0, %v23_v24 }
  0xe4   :  { %v383_v25 = vpop.f32.mrb[0].mxu0  ;;  %v395_v26 = vpop.f32.mrb[0].mxu1 }
  0xe5   :  { %271 = vrot.lane.b32.xlu1 %v395_v26, %s414_s9  ;;  %v198_v27 = vpop.f32.mrb[1].mxu1  ;;  %255 = vrot.lane.b32.xlu0 %v383_v25, %s414_s9  ;;  %v158_v28 = vpop.f32.mrb[1].mxu0 }
  0xe8   :  { %v386_v29 = vpop.f32.mrb[2].mxu0  ;;  %v398_v30 = vpop.f32.mrb[2].mxu1 }
  0xe9   :  { %253 = vrot.lane.b32.xlu0 %v158_v28, %s414_s9  ;;  %259 = vrot.lane.b32.xlu1 %v386_v29, %s414_s9  ;;  %v168_v31 = vpop.f32.mrb[3].mxu0  ;;  %v208_v32 = vpop.f32.mrb[3].mxu1 }
  0xec   :  { %v389_v33 = vpop.f32.mrb[4].mxu0  ;;  %v401_v34 = vpop.f32.mrb[4].mxu1 }
  0xed   :  { %269 = vrot.lane.b32.xlu0 %v198_v27, %s414_s9  ;;  %275 = vrot.lane.b32.xlu1 %v398_v30, %s414_s9  ;;  %v178_v35 = vpop.f32.mrb[5].mxu0  ;;  %v218_v36 = vpop.f32.mrb[5].mxu1 }
  0xf0   :  { %v392_v37 = vpop.f32.mrb[6].mxu0  ;;  %v404_v38 = vpop.f32.mrb[6].mxu1 }
  0xf1   :  { %273 = vrot.lane.b32.xlu0 %v208_v32, %s414_s9  ;;  %257 = vrot.lane.b32.xlu1 %v168_v31, %s414_s9  ;;  %v188_v39 = vpop.f32.mrb[7].mxu0  ;;  %v228_v40 = vpop.f32.mrb[7].mxu1 }
  0xf5   :  { %263 = vrot.lane.b32.xlu1 %v389_v33, %s414_s9  ;;  %261 = vrot.lane.b32.xlu0 %v178_v35, %s414_s9 }
  0xf9   :  { %279 = vrot.lane.b32.xlu1 %v401_v34, %s414_s9  ;;  %277 = vrot.lane.b32.xlu0 %v218_v36, %s414_s9 }
  0xfd   :  { %267 = vrot.lane.b32.xlu1 %v392_v37, %s414_s9  ;;  %265 = vrot.lane.b32.xlu0 %v188_v39, %s414_s9 }
 0x101   :  { %283 = vrot.lane.b32.xlu1 %v404_v38, %s414_s9  ;;  %281 = vrot.lane.b32.xlu0 %v228_v40, %s414_s9 }
 0x157   :  { %v272_v41 = vpop.permute.xlu1 %271  ;;  %v256_v42 = vpop.permute.xlu0 %255 }
 0x158   :  { %v311_v43 = vsel %vm301_vm8, %v395_v26, %v272_v41  ;;  %v303_v44 = vsel %vm301_vm8, %v383_v25, %v256_v42 }
 0x159   :  { %328 = vst.msk [vmem:[%s570_s1 + $0x48] sm:$0xff] %vm318_vm9, %v311_v43  ;;  %320 = vst.msk [vmem:[%s570_s1 + $0x8] sm:$0xff] %vm318_vm9, %v303_v44 }
 0x15b   :  { %v254_v45 = vpop.permute.xlu0 %253  ;;  %v260_v46 = vpop.permute.xlu1 %259 }
 0x15c   :  { %v302_v47 = vsel %vm301_vm8, %v158_v28, %v254_v45  ;;  %v305_v48 = vsel %vm301_vm8, %v386_v29, %v260_v46 }
 0x15d   :  { %319 = vst.msk [vmem:[%s570_s1] sm:$0xff] %vm318_vm9, %v302_v47  ;;  %322 = vst.msk [vmem:[%s570_s1 + $0x18] sm:$0xff] %vm318_vm9, %v305_v48 }
 0x15f   :  { %v270_v49 = vpop.permute.xlu0 %269  ;;  %v276_v50 = vpop.permute.xlu1 %275 }
 0x160   :  { %v310_v51 = vsel %vm301_vm8, %v198_v27, %v270_v49  ;;  %v313_v52 = vsel %vm301_vm8, %v398_v30, %v276_v50 }
 0x161   :  { %327 = vst.msk [vmem:[%s570_s1 + $0x40] sm:$0xff] %vm318_vm9, %v310_v51  ;;  %330 = vst.msk [vmem:[%s570_s1 + $0x58] sm:$0xff] %vm318_vm9, %v313_v52 }
 0x163   :  { %v274_v53 = vpop.permute.xlu0 %273  ;;  %v258_v54 = vpop.permute.xlu1 %257 }
 0x164   :  { %v312_v55 = vsel %vm301_vm8, %v208_v32, %v274_v53  ;;  %v304_v56 = vsel %vm301_vm8, %v168_v31, %v258_v54 }
 0x165   :  { %329 = vst.msk [vmem:[%s570_s1 + $0x50] sm:$0xff] %vm318_vm9, %v312_v55  ;;  %321 = vst.msk [vmem:[%s570_s1 + $0x10] sm:$0xff] %vm318_vm9, %v304_v56 }
 0x167   :  { %v264_v57 = vpop.permute.xlu1 %263  ;;  %v262_v58 = vpop.permute.xlu0 %261 }
 0x168   :  { %v307_v59 = vsel %vm301_vm8, %v389_v33, %v264_v57  ;;  %v306_v60 = vsel %vm301_vm8, %v178_v35, %v262_v58 }
 0x169   :  { %324 = vst.msk [vmem:[%s570_s1 + $0x28] sm:$0xff] %vm318_vm9, %v307_v59  ;;  %323 = vst.msk [vmem:[%s570_s1 + $0x20] sm:$0xff] %vm318_vm9, %v306_v60 }
 0x16b   :  { %v280_v61 = vpop.permute.xlu1 %279  ;;  %v278_v62 = vpop.permute.xlu0 %277 }
 0x16c   :  { %v315_v63 = vsel %vm301_vm8, %v401_v34, %v280_v61  ;;  %v314_v0 = vsel %vm301_vm8, %v218_v36, %v278_v62 }
 0x16d   :  { %332 = vst.msk [vmem:[%s570_s1 + $0x68] sm:$0xff] %vm318_vm9, %v315_v63  ;;  %331 = vst.msk [vmem:[%s570_s1 + $0x60] sm:$0xff] %vm318_vm9, %v314_v0 }
 0x16f   :  { %v268_v1 = vpop.permute.xlu1 %267  ;;  %v266_v2 = vpop.permute.xlu0 %265 }
 0x170   :  { %v309_v3 = vsel %vm301_vm8, %v392_v37, %v268_v1  ;;  %v308_v4 = vsel %vm301_vm8, %v188_v39, %v266_v2 }
 0x171   :  { %326 = vst.msk [vmem:[%s570_s1 + $0x38] sm:$0xff] %vm318_vm9, %v309_v3  ;;  %325 = vst.msk [vmem:[%s570_s1 + $0x30] sm:$0xff] %vm318_vm9, %v308_v4 }
 0x173   :  { %v284_v5 = vpop.permute.xlu1 %283  ;;  %v282_v6 = vpop.permute.xlu0 %281 }
 0x174   :  { %v317_v7 = vsel %vm301_vm8, %v404_v38, %v284_v5  ;;  %v316_v8 = vsel %vm301_vm8, %v228_v40, %v282_v6 }
 0x175   :  { %334 = vst.msk [vmem:[%s570_s1 + $0x78] sm:$0xff] %vm318_vm9, %v317_v7  ;;  %333 = vst.msk [vmem:[%s570_s1 + $0x70] sm:$0xff] %vm318_vm9, %v316_v8 }

</bundles_post_ra>
